<compile_context>
chip_gen: v7x
topology: tpu7x:2x2x1
jax: 0.10.0
libtpu: 0.0.40
codegen_flags: <defaults>
</compile_context>

<pallas_src>
import functools
import math

import jax
import jax.numpy as jnp
from jax.experimental import pallas as pl
from jax.experimental.pallas import tpu as pltpu

HIDDEN1 = 128
HIDDEN2 = 64
HIDDEN2_PAD = 128  # hidden width padded to a full 128-lane vreg
OUT_PAD = 128      # fused actor||critic head width (lane-dense store)


def _round_up(x, m):
    return ((x + m - 1) // m) * m


def _num_tensorcores():
    """Best-effort TensorCore count per device (v7x has 2). Safe fallback = 1."""
    try:
        dev = jax.devices()[0]
        n = int(getattr(dev, "num_cores", 0) or 0)
        if n > 1:
            return n
        kind = str(getattr(dev, "device_kind", "")).lower()
        return 2 if "v7" in kind else 1
    except Exception:
        return 1


def actor_critic_kernel(x_ref, w1_ref, b1_ref, w2_ref, b2_ref, wh_ref, bh_ref,
                        mask_ref, sel_ref, out_ref, *, cast_activations):
    # in-kernel cast of the input (no-op for f32 weights); hides under the matmul
    x = x_ref[...].astype(w1_ref.dtype)

    # feature_extractor: Linear(state_dim, 128) + ReLU   (f32 accumulate)
    h1 = jnp.dot(x, w1_ref[...], preferred_element_type=jnp.float32) + b1_ref[...]
    h1 = jnp.maximum(h1, 0.0)
    if cast_activations:
        h1 = h1.astype(w2_ref.dtype)

    # feature_extractor: Linear(128, 64 -> padded 128) + ReLU
    h2 = jnp.dot(h1, w2_ref[...], preferred_element_type=jnp.float32) + b2_ref[...]
    h2 = jnp.maximum(h2, 0.0)
    if cast_activations:
        h2 = h2.astype(wh_ref.dtype)

    # fused heads: lanes [0, A) = actor logits, lane A = critic value, rest 0
    heads = jnp.dot(h2, wh_ref[...], preferred_element_type=jnp.float32) + bh_ref[...]

    # numerically-stable softmax over the logit lanes only, via a precomputed
    # additive mask row (0 on logit lanes, -1e30 elsewhere)
    logits = heads + mask_ref[...]
    m = jnp.max(logits, axis=-1, keepdims=True)
    e = jnp.exp(logits - m)                       # masked lanes -> exp(-huge) = 0
    denom = jnp.sum(e, axis=-1, keepdims=True)
    probs = e / denom                             # exact division (probs sum to 1)

    # single lane-dense store: probs in [0, A), raw critic value in lane A, 0 after.
    # sel_ref is a precomputed 0/1 row with a 1 only at lane A.
    out = probs + sel_ref[...] * (heads - probs)
    out_ref[...] = out.astype(out_ref.dtype)


def actor_critic_forward(state, params, action_dim, *, block_b=1024,
                         out_store_dtype=jnp.bfloat16, cast_activations=True,
                         num_cores=None, vmem_limit_bytes=None):
    """state: (B, state_dim) f32. Returns (action_probs (B, A) f32, value (B, 1) f32)."""
    B, S = state.shape
    out_pad = params["wh"].shape[1]

    if num_cores is None:
        num_cores = _num_tensorcores()

    # Batch tile: as large as possible (amortize ~0.35us/step), but guarantee at
    # least `num_cores` grid steps on multi-TC chips so ("parallel",) shards the
    # batch. Small batches collapse to a single step (bb == B, full-dim block).
    bb = min(block_b, B)
    if num_cores > 1 and B >= 8 * num_cores:
        bb = min(bb, _round_up(pl.cdiv(B, num_cores), 8))
    bb = max(bb, 1)
    grid = (pl.cdiv(B, bb),)

    def const_spec(arr):  # weights / biases / mask rows stay VMEM-resident
        return pl.BlockSpec(arr.shape, lambda i, nd=arr.ndim: (0,) * nd)

    weight_args = (params["w1"], params["b1"], params["w2"], params["b2"],
                   params["wh"], params["bh"], params["logit_mask"],
                   params["value_sel"])

    out_itemsize = jnp.dtype(out_store_dtype).itemsize
    flops = 2 * B * (S * HIDDEN1 + HIDDEN1 * HIDDEN2_PAD + HIDDEN2_PAD * out_pad)
    bytes_accessed = (
        B * S * state.dtype.itemsize
        + sum(a.size * a.dtype.itemsize for a in weight_args)
        + B * out_pad * out_itemsize
    )

    # NOTE: at block_b <= 4096 all buffers + intermediates fit well under the
    # 32 MiB scoped-VMEM default on every generation; raise vmem_limit_bytes
    # only if you push block_b much higher.
    cp_kwargs = dict(dimension_semantics=("parallel",))
    if vmem_limit_bytes is not None:
        cp_kwargs["vmem_limit_bytes"] = vmem_limit_bytes

    out = pl.pallas_call(
        functools.partial(actor_critic_kernel, cast_activations=cast_activations),
        out_shape=jax.ShapeDtypeStruct((B, out_pad), out_store_dtype),
        grid=grid,
        in_specs=[pl.BlockSpec((bb, S), lambda i: (i, 0))]
                 + [const_spec(a) for a in weight_args],
        out_specs=pl.BlockSpec((bb, out_pad), lambda i: (i, 0)),
        compiler_params=pltpu.CompilerParams(**cp_kwargs),
        cost_estimate=pl.CostEstimate(
            flops=flops,
            transcendentals=B * out_pad,
            bytes_accessed=bytes_accessed,
        ),
    )(state, *weight_args)

    probs = out[:, :action_dim].astype(jnp.float32)
    value = out[:, action_dim:action_dim + 1].astype(jnp.float32)
    return probs, value


def init_params(key, state_dim, action_dim, dtype=jnp.float32):
    """nn.Linear-style init (uniform +-1/sqrt(fan_in)). Weights stored (in, out)
    i.e. transposed vs. PyTorch; hidden width and heads padded / fused for TPU."""
    ks = jax.random.split(key, 8)

    def linear(kw, kb, fan_in, fan_out):
        bound = 1.0 / math.sqrt(fan_in)
        w = jax.random.uniform(kw, (fan_in, fan_out), jnp.float32, -bound, bound)
        b = jax.random.uniform(kb, (1, fan_out), jnp.float32, -bound, bound)
        return w, b

    w1, b1 = linear(ks[0], ks[1], state_dim, HIDDEN1)
    w2, b2 = linear(ks[2], ks[3], HIDDEN1, HIDDEN2)
    wa, ba = linear(ks[4], ks[5], HIDDEN2, action_dim)
    wc, bc = linear(ks[6], ks[7], HIDDEN2, 1)

    out_pad = max(OUT_PAD, _round_up(action_dim + 1, 128))

    # pad hidden 64 -> 128 with zero columns (ReLU keeps the padding at 0)
    w2_p = jnp.zeros((HIDDEN1, HIDDEN2_PAD), jnp.float32).at[:, :HIDDEN2].set(w2)
    b2_p = jnp.zeros((1, HIDDEN2_PAD), jnp.float32).at[:, :HIDDEN2].set(b2)

    # fuse actor || critic into one lane-dense (128, out_pad) head
    wh = jnp.zeros((HIDDEN2_PAD, out_pad), jnp.float32)
    wh = wh.at[:HIDDEN2, :action_dim].set(wa)
    wh = wh.at[:HIDDEN2, action_dim:action_dim + 1].set(wc)
    bh = jnp.zeros((1, out_pad), jnp.float32)
    bh = bh.at[:, :action_dim].set(ba)
    bh = bh.at[:, action_dim:action_dim + 1].set(bc)

    # precomputed constant rows (replace per-step iota + compares + selects)
    lane = jnp.arange(out_pad)
    logit_mask = jnp.where(lane < action_dim, 0.0, -1e30).astype(jnp.float32)[None, :]
    value_sel = (lane == action_dim).astype(jnp.float32)[None, :]

    return dict(
        # matmul operands in the compute dtype; biases stay f32 (added to f32 acc)
        w1=w1.astype(dtype), b1=b1,
        w2=w2_p.astype(dtype), b2=b2_p,
        wh=wh.astype(dtype), bh=bh,
        logit_mask=logit_mask, value_sel=value_sel,
        # unpadded f32 copies for the pure-JAX reference
        ref=dict(w1=w1, b1=b1, w2=w2, b2=b2, wa=wa, ba=ba, wc=wc, bc=bc),
    )


def reference_forward(state, p):
    h1 = jnp.maximum(state @ p["w1"] + p["b1"], 0.0)
    h2 = jnp.maximum(h1 @ p["w2"] + p["b2"], 0.0)
    logits = h2 @ p["wa"] + p["ba"]
    probs = jax.nn.softmax(logits, axis=-1)
    value = h2 @ p["wc"] + p["bc"]
    return probs, value


if __name__ == "__main__":
    STATE_DIM, ACTION_DIM = 16, 4
    key = jax.random.PRNGKey(0)
    k_params, k_state, k_big = jax.random.split(key, 3)

    # --- small-shape correctness check (B=2, f32 params, f32 output store) ---
    params = init_params(k_params, STATE_DIM, ACTION_DIM, dtype=jnp.float32)
    state = jax.random.normal(k_state, (2, STATE_DIM), jnp.float32)

    probs, value = actor_critic_forward(state, params, ACTION_DIM,
                                        out_store_dtype=jnp.float32)
    jax.block_until_ready((probs, value))

    ref_probs, ref_value = reference_forward(state, params["ref"])
    assert probs.shape == (2, ACTION_DIM) and value.shape == (2, 1)
    assert jnp.allclose(probs, ref_probs, atol=1e-4)
    assert jnp.allclose(value, ref_value, atol=1e-4, rtol=1e-4)
    assert jnp.allclose(jnp.sum(probs, axis=-1), 1.0, atol=1e-4)

    # --- larger batch: bf16 weights + default bf16 output slab, multi-step grid ---
    params_bf16 = init_params(k_params, STATE_DIM, ACTION_DIM, dtype=jnp.bfloat16)
    big_state = jax.random.normal(k_big, (2048, STATE_DIM), jnp.float32)
    probs_b, value_b = actor_critic_forward(big_state, params_bf16, ACTION_DIM,
                                            block_b=1024)
    jax.block_until_ready((probs_b, value_b))

    ref_probs_b, ref_value_b = reference_forward(big_state, params_bf16["ref"])
    assert probs_b.shape == (2048, ACTION_DIM) and value_b.shape == (2048, 1)
    assert jnp.allclose(probs_b, ref_probs_b, atol=3e-2)   # bf16 weights + bf16 store
    assert jnp.allclose(value_b, ref_value_b, atol=5e-2, rtol=5e-2)
    assert jnp.allclose(jnp.sum(probs_b, axis=-1), 1.0, atol=2e-2)

    print("KERNEL_OK")
</pallas_src>

<mosaic_0001>
module attributes {stable_mosaic.version = 11 : i64} {
  func.func @actor_critic_kernel(%arg0: i32, %arg1: memref<2x16xf32, #tpu.memory_space<vmem>>, %arg2: memref<16x128xf32, #tpu.memory_space<vmem>>, %arg3: memref<1x128xf32, #tpu.memory_space<vmem>>, %arg4: memref<128x128xf32, #tpu.memory_space<vmem>>, %arg5: memref<1x128xf32, #tpu.memory_space<vmem>>, %arg6: memref<128x128xf32, #tpu.memory_space<vmem>>, %arg7: memref<1x128xf32, #tpu.memory_space<vmem>>, %arg8: memref<1x128xf32, #tpu.memory_space<vmem>>, %arg9: memref<1x128xf32, #tpu.memory_space<vmem>>, %arg10: memref<2x128xf32, #tpu.memory_space<vmem>>) attributes {dimension_semantics = [#tpu.dimension_semantics<parallel>], iteration_bounds = array<i64: 1>, scalar_prefetch = 0 : i64, scratch_operands = 0 : i64, tpu.core_type = #tpu.core_type<tc>, window_params = [{transform_indices = @transform_0, window_bounds = array<i64: 2, 16>}, {pipeline_mode = #tpu.pipeline_mode<synchronous>, transform_indices = @transform_1, window_bounds = array<i64: 16, 128>}, {pipeline_mode = #tpu.pipeline_mode<synchronous>, transform_indices = @transform_2, window_bounds = array<i64: 1, 128>}, {pipeline_mode = #tpu.pipeline_mode<synchronous>, transform_indices = @transform_3, window_bounds = array<i64: 128, 128>}, {pipeline_mode = #tpu.pipeline_mode<synchronous>, transform_indices = @transform_4, window_bounds = array<i64: 1, 128>}, {pipeline_mode = #tpu.pipeline_mode<synchronous>, transform_indices = @transform_5, window_bounds = array<i64: 128, 128>}, {pipeline_mode = #tpu.pipeline_mode<synchronous>, transform_indices = @transform_6, window_bounds = array<i64: 1, 128>}, {pipeline_mode = #tpu.pipeline_mode<synchronous>, transform_indices = @transform_7, window_bounds = array<i64: 1, 128>}, {pipeline_mode = #tpu.pipeline_mode<synchronous>, transform_indices = @transform_8, window_bounds = array<i64: 1, 128>}, {transform_indices = @transform_9, window_bounds = array<i64: 2, 128>}]} {
    %c0 = arith.constant 0 : index
    %c0_0 = arith.constant 0 : index
    %0 = vector.load %arg1[%c0, %c0_0] : memref<2x16xf32, #tpu.memory_space<vmem>>, vector<2x16xf32>
    %c0_1 = arith.constant 0 : index
    %c0_2 = arith.constant 0 : index
    %1 = vector.load %arg2[%c0_1, %c0_2] : memref<16x128xf32, #tpu.memory_space<vmem>>, vector<16x128xf32>
    %cst = arith.constant dense<0.000000e+00> : vector<2x128xf32>
    %2 = tpu.matmul %0, %1, %cst {dimension_numbers = #tpu.dot_dimension_numbers<[1], [0], [0], [1], [0, 0, 1, 1], [], []>} : vector<2x16xf32>, vector<16x128xf32>, vector<2x128xf32> -> vector<2x128xf32>
    %c0_3 = arith.constant 0 : index
    %c0_4 = arith.constant 0 : index
    %3 = vector.load %arg3[%c0_3, %c0_4] : memref<1x128xf32, #tpu.memory_space<vmem>>, vector<1x128xf32>
    %4 = vector.broadcast %3 : vector<1x128xf32> to vector<2x128xf32>
    %5 = arith.addf %2, %4 : vector<2x128xf32>
    %cst_5 = arith.constant 0.000000e+00 : f32
    %6 = vector.broadcast %cst_5 : f32 to vector<2x128xf32>
    %7 = arith.maximumf %5, %6 : vector<2x128xf32>
    %c0_6 = arith.constant 0 : index
    %c0_7 = arith.constant 0 : index
    %8 = vector.load %arg4[%c0_6, %c0_7] : memref<128x128xf32, #tpu.memory_space<vmem>>, vector<128x128xf32>
    %cst_8 = arith.constant dense<0.000000e+00> : vector<2x128xf32>
    %9 = tpu.matmul %7, %8, %cst_8 {dimension_numbers = #tpu.dot_dimension_numbers<[1], [0], [0], [1], [0, 0, 1, 1], [], []>} : vector<2x128xf32>, vector<128x128xf32>, vector<2x128xf32> -> vector<2x128xf32>
    %c0_9 = arith.constant 0 : index
    %c0_10 = arith.constant 0 : index
    %10 = vector.load %arg5[%c0_9, %c0_10] : memref<1x128xf32, #tpu.memory_space<vmem>>, vector<1x128xf32>
    %11 = vector.broadcast %10 : vector<1x128xf32> to vector<2x128xf32>
    %12 = arith.addf %9, %11 : vector<2x128xf32>
    %cst_11 = arith.constant 0.000000e+00 : f32
    %13 = vector.broadcast %cst_11 : f32 to vector<2x128xf32>
    %14 = arith.maximumf %12, %13 : vector<2x128xf32>
    %c0_12 = arith.constant 0 : index
    %c0_13 = arith.constant 0 : index
    %15 = vector.load %arg6[%c0_12, %c0_13] : memref<128x128xf32, #tpu.memory_space<vmem>>, vector<128x128xf32>
    %cst_14 = arith.constant dense<0.000000e+00> : vector<2x128xf32>
    %16 = tpu.matmul %14, %15, %cst_14 {dimension_numbers = #tpu.dot_dimension_numbers<[1], [0], [0], [1], [0, 0, 1, 1], [], []>} : vector<2x128xf32>, vector<128x128xf32>, vector<2x128xf32> -> vector<2x128xf32>
    %c0_15 = arith.constant 0 : index
    %c0_16 = arith.constant 0 : index
    %17 = vector.load %arg7[%c0_15, %c0_16] : memref<1x128xf32, #tpu.memory_space<vmem>>, vector<1x128xf32>
    %18 = vector.broadcast %17 : vector<1x128xf32> to vector<2x128xf32>
    %19 = arith.addf %16, %18 : vector<2x128xf32>
    %c0_17 = arith.constant 0 : index
    %c0_18 = arith.constant 0 : index
    %20 = vector.load %arg8[%c0_17, %c0_18] : memref<1x128xf32, #tpu.memory_space<vmem>>, vector<1x128xf32>
    %21 = vector.broadcast %20 : vector<1x128xf32> to vector<2x128xf32>
    %22 = arith.addf %19, %21 : vector<2x128xf32>
    %cst_19 = arith.constant dense<0xFF800000> : vector<2xf32>
    %23 = vector.multi_reduction <maximumf>, %22, %cst_19 [1] : vector<2x128xf32> to vector<2xf32>
    %24 = vector.shape_cast %23 : vector<2xf32> to vector<2x1xf32>
    %25 = vector.broadcast %24 : vector<2x1xf32> to vector<2x128xf32>
    %26 = arith.subf %22, %25 : vector<2x128xf32>
    %27 = math.exp %26 : vector<2x128xf32>
    %cst_20 = arith.constant dense<0.000000e+00> : vector<2xf32>
    %28 = vector.multi_reduction <add>, %27, %cst_20 [1] : vector<2x128xf32> to vector<2xf32>
    %29 = vector.shape_cast %28 : vector<2xf32> to vector<2x1xf32>
    %30 = vector.broadcast %29 : vector<2x1xf32> to vector<2x128xf32>
    %31 = arith.divf %27, %30 : vector<2x128xf32>
    %c0_21 = arith.constant 0 : index
    %c0_22 = arith.constant 0 : index
    %32 = vector.load %arg9[%c0_21, %c0_22] : memref<1x128xf32, #tpu.memory_space<vmem>>, vector<1x128xf32>
    %33 = arith.subf %19, %31 : vector<2x128xf32>
    %34 = vector.broadcast %32 : vector<1x128xf32> to vector<2x128xf32>
    %35 = arith.mulf %34, %33 : vector<2x128xf32>
    %36 = arith.addf %31, %35 : vector<2x128xf32>
    %c0_23 = arith.constant 0 : index
    %c0_24 = arith.constant 0 : index
    %37 = vector.load %arg10[%c0_23, %c0_24] : memref<2x128xf32, #tpu.memory_space<vmem>>, vector<2x128xf32>
    tpu.vector_store %arg10[%c0_23, %c0_24], %36 {strides = array<i32>} : memref<2x128xf32, #tpu.memory_space<vmem>>, vector<2x128xf32>,
    return
  }
  func.func @transform_0(%arg0: i32) -> (i32, i32) {
    %c0_i32 = arith.constant 0 : i32
    %c0_i32_0 = arith.constant 0 : i32
    return %arg0, %c0_i32 : i32, i32
  }
  func.func @transform_1(%arg0: i32) -> (i32, i32) {
    %c0_i32 = arith.constant 0 : i32
    %c0_i32_0 = arith.constant 0 : i32
    %c0_i32_1 = arith.constant 0 : i32
    return %c0_i32, %c0_i32_0 : i32, i32
  }
  func.func @transform_2(%arg0: i32) -> (i32, i32) {
    %c0_i32 = arith.constant 0 : i32
    %c0_i32_0 = arith.constant 0 : i32
    %c0_i32_1 = arith.constant 0 : i32
    return %c0_i32, %c0_i32_0 : i32, i32
  }
  func.func @transform_3(%arg0: i32) -> (i32, i32) {
    %c0_i32 = arith.constant 0 : i32
    %c0_i32_0 = arith.constant 0 : i32
    %c0_i32_1 = arith.constant 0 : i32
    return %c0_i32, %c0_i32_0 : i32, i32
  }
  func.func @transform_4(%arg0: i32) -> (i32, i32) {
    %c0_i32 = arith.constant 0 : i32
    %c0_i32_0 = arith.constant 0 : i32
    %c0_i32_1 = arith.constant 0 : i32
    return %c0_i32, %c0_i32_0 : i32, i32
  }
  func.func @transform_5(%arg0: i32) -> (i32, i32) {
    %c0_i32 = arith.constant 0 : i32
    %c0_i32_0 = arith.constant 0 : i32
    %c0_i32_1 = arith.constant 0 : i32
    return %c0_i32, %c0_i32_0 : i32, i32
  }
  func.func @transform_6(%arg0: i32) -> (i32, i32) {
    %c0_i32 = arith.constant 0 : i32
    %c0_i32_0 = arith.constant 0 : i32
    %c0_i32_1 = arith.constant 0 : i32
    return %c0_i32, %c0_i32_0 : i32, i32
  }
  func.func @transform_7(%arg0: i32) -> (i32, i32) {
    %c0_i32 = arith.constant 0 : i32
    %c0_i32_0 = arith.constant 0 : i32
    %c0_i32_1 = arith.constant 0 : i32
    return %c0_i32, %c0_i32_0 : i32, i32
  }
  func.func @transform_8(%arg0: i32) -> (i32, i32) {
    %c0_i32 = arith.constant 0 : i32
    %c0_i32_0 = arith.constant 0 : i32
    %c0_i32_1 = arith.constant 0 : i32
    return %c0_i32, %c0_i32_0 : i32, i32
  }
  func.func @transform_9(%arg0: i32) -> (i32, i32) {
    %c0_i32 = arith.constant 0 : i32
    %c0_i32_0 = arith.constant 0 : i32
    return %arg0, %c0_i32 : i32, i32
  }
}

</mosaic_0001>

<bundles_post_ra>
// kernel: tpu_custom_call.1
= control target key start
LH: loop header
LB: loop body
LE: loop exit
PB: predicated region body
PF: predicated region fallthrough
CT: control target
= control target key end

     0   :  { %14 = vsyncpa [#allocation3], 0  ;;  %s873_s0 = inlined_call_operand.hbm [shape: f32[2,16], index: 0, kind: input, shape index: {}]   ;;  %s874_s1 = inlined_call_operand.hbm [shape: f32[16,128], index: 1, kind: input, shape index: {}]   ;;  %s875_s2 = inlined_call_operand.vmem [shape: f32[1,128], index: 2, kind: input, shape index: {}]   ;;  %s876_s3 = inlined_call_operand.hbm [shape: f32[128,128], index: 3, kind: input, shape index: {}]   ;;  %s877_s4 = inlined_call_operand.vmem [shape: f32[1,128], index: 4, kind: input, shape index: {}]   ;;  %s878_s5 = inlined_call_operand.hbm [shape: f32[128,128], index: 5, kind: input, shape index: {}]   ;;  %s879_s6 = inlined_call_operand.vmem [shape: f32[1,128], index: 6, kind: input, shape index: {}]   ;;  %s880_s7 = inlined_call_operand.vmem [shape: f32[1,128], index: 7, kind: input, shape index: {}]   ;;  %s881_s8 = inlined_call_operand.vmem [shape: f32[1,128], index: 8, kind: input, shape index: {}]   ;;  %s882_s9 = inlined_call_operand.hbm [shape: f32[2,128], index: 9, kind: output, shape index: {}]  }
   0x1   :  { %15 = vsyncpa [#allocation6], 0 }
   0x2   :  { %16 = vsyncpa [#allocation9], 0 }
   0x3   :  { %17 = vsyncpa [#allocation4], 0  ;;  %s709_s30 = smov [#allocation5]   ;;  %s591_s13 = scalar_lea.hbm %s874_s1, 256 }
   0x4   :  { %s33_s10 = sshll.u32 %s709_s30, 4  ;;  %p592_p0 = scmp.ne.s32.totalorder %s874_s1, %s591_s13  ;;  %s34_s10 = int_to_ptr.vmem [resolvable:$true] %s33_s10 }
   0x5   :  { %p595_p1 = scmp.lt.u32.totalorder %s591_s13, %s874_s1 }
   0x7   :  { %p597_p2 = pnand %p595_p1, %p592_p0 }
   0x9   :  { %600 = shalt.err (!%p597_p2)
}
   0xa   :  { %s601_s18 = scalar_lea.vmem %s34_s10, 256  ;;  %p606_p4 = scmp.lt.s32.totalorder %s34_s10, %s34_s10 }
   0xb   :  { %p602_p3 = scmp.ne.s32.totalorder %s34_s10, %s601_s18  ;;  %p607_p5 = scmp.lt.s32.totalorder %s601_s18, %s601_s18 }
   0xd   :  { %p608_p6 = por %p607_p5, %p606_p4 }
   0xf   :  { %p609_p7 = pnand %p608_p6, %p602_p3 }
  0x11   :  { %612 = shalt.err (!%p609_p7)
}
  0x12   :  { %s710_s19 = smov 128   ;;  %s711_s20 = smov 8  }
  0x13   :  { %39 = dma.hbm_to_vmem [thread:$0]  %s874_s1, 256, %s34_s10, [#allocation6], %s710_s19, %s710_s19, %s711_s20  }
  0x14   :  { %s712_s23 = smov [#allocation2]   ;;  %s713_s25 = smov [#allocation7]  }
  0x15   :  { %s24_s24 = sshll.u32 %s712_s23, 4  ;;  %s47_s26 = sshll.u32 %s713_s25, 4  ;;  %s25_s24 = int_to_ptr.vmem [resolvable:$true] %s24_s24  ;;  %s48_s26 = int_to_ptr.vmem [resolvable:$true] %s47_s26 }
  0x16   :  { %s613_s29 = scalar_lea.hbm %s873_s0, 32 }
  0x17   :  { %p614_p8 = scmp.ne.s32.totalorder %s873_s0, %s613_s29  ;;  %p617_p9 = scmp.lt.u32.totalorder %s613_s29, %s873_s0 }
  0x19   :  { %p619_p10 = pnand %p617_p9, %p614_p8 }
  0x1b   :  { %622 = shalt.err (!%p619_p10)
}
  0x1c   :  { %s623_s1 = scalar_lea.vmem %s25_s24, 32  ;;  %p628_p12 = scmp.lt.s32.totalorder %s25_s24, %s25_s24 }
  0x1d   :  { %p624_p11 = scmp.ne.s32.totalorder %s25_s24, %s623_s1  ;;  %p629_p13 = scmp.lt.s32.totalorder %s623_s1, %s623_s1 }
  0x1f   :  { %p630_p0 = por %p629_p13, %p628_p12 }
  0x21   :  { %p631_p1 = pnand %p630_p0, %p624_p11 }
  0x23   :  { %634 = shalt.err (!%p631_p1)
}
  0x24   :  { %27 = dma.hbm_to_vmem [thread:$0]  %s873_s0, 32, %s25_s24, [#allocation3]  }
  0x25   :  { %s635_s17 = scalar_lea.hbm %s876_s3, 2048 }
  0x26   :  { %p636_p2 = scmp.ne.s32.totalorder %s876_s3, %s635_s17  ;;  %p639_p3 = scmp.lt.u32.totalorder %s635_s17, %s876_s3 }
  0x28   :  { %p641_p4 = pnand %p639_p3, %p636_p2 }
  0x2a   :  { %644 = shalt.err (!%p641_p4)
}
  0x2b   :  { %s645_s25 = scalar_lea.vmem %s48_s26, 2048  ;;  %p650_p6 = scmp.lt.s32.totalorder %s48_s26, %s48_s26 }
  0x2c   :  { %p646_p5 = scmp.ne.s32.totalorder %s48_s26, %s645_s25  ;;  %p651_p7 = scmp.lt.s32.totalorder %s645_s25, %s645_s25 }
  0x2e   :  { %p652_p8 = por %p651_p7, %p650_p6 }
  0x30   :  { %p653_p9 = pnand %p652_p8, %p646_p5 }
  0x32   :  { %656 = shalt.err (!%p653_p9)
}
  0x33   :  { %53 = dma.hbm_to_vmem [thread:$0]  %s876_s3, 2048, %s48_s26, [#allocation6], %s710_s19, %s710_s19, %s711_s20  }
  0x34   :  { %s714_s27 = smov [#allocation8]   ;;  %s657_s11 = scalar_lea.hbm %s878_s5, 2048 }
  0x35   :  { %s61_s28 = sshll.u32 %s714_s27, 4  ;;  %p658_p10 = scmp.ne.s32.totalorder %s878_s5, %s657_s11  ;;  %s62_s28 = int_to_ptr.vmem [resolvable:$true] %s61_s28 }
  0x36   :  { %p661_p11 = scmp.lt.u32.totalorder %s657_s11, %s878_s5 }
  0x38   :  { %p663_p12 = pnand %p661_p11, %p658_p10 }
  0x3a   :  { %666 = shalt.err (!%p663_p12)
}
  0x3b   :  { %s667_s14 = scalar_lea.vmem %s62_s28, 2048  ;;  %p672_p0 = scmp.lt.s32.totalorder %s62_s28, %s62_s28 }
  0x3c   :  { %p668_p13 = scmp.ne.s32.totalorder %s62_s28, %s667_s14  ;;  %p673_p1 = scmp.lt.s32.totalorder %s667_s14, %s667_s14 }
  0x3e   :  { %p674_p2 = por %p673_p1, %p672_p0 }
  0x40   :  { %p675_p3 = pnand %p674_p2, %p668_p13 }
  0x42   :  { %678 = shalt.err (!%p675_p3)
}
  0x43   :  { %67 = dma.hbm_to_vmem [thread:$0]  %s878_s5, 2048, %s62_s28, [#allocation9], %s710_s19, %s710_s19, %s711_s20  }
  0x44   :  { %701 = dma.done.wait [#allocation3], 32  }
  0x45   :  { %702 = vsyncadd [#allocation3], 4294967264 }
  0x46   :  { %703 = dma.done.wait [#allocation6], 2304  }
  0x47   :  { %704 = vsyncadd [#allocation6], 4294964992 }
  0x48   :  { %705 = dma.done.wait [#allocation9], 2048  }
  0x49   :  { %706 = vsyncadd [#allocation9], 4294965248  ;;  %v715_v0 = vmov 0.0|0.0   ;;  %vm716_vm0 = vmmov 0   ;;  %v717_v1 = vmov 0.0   ;;  %v87_v2 = vld [vmem:[#allocation5] sm:$0xff] }
  0x4a   :  { %526 = vmatprep.subr.bf16.mxu0 %v715_v0  ;;  %453 = vmatprep.mubr.msk.f32.mxu0 %vm716_vm0, %v717_v1  ;;  %v88_v3 = vld [vmem:[#allocation5 + $0x8] sm:$0xff]  ;;  %v171_v5 = vld [vmem:[#allocation7] sm:$0xff]  ;;  %v172_v6 = vld [vmem:[#allocation7 + $0x8] sm:$0xff]  ;;  %vm96_vm1 = vcmask 130048   ;;  %vm366_vm2 = vcmask 1041408  }
  0x4b   :  { %529 = vmatprep.subr.bf16.mxu1 %v715_v0  ;;  %488 = vmatprep.mubr.msk.f32.mxu1 %vm716_vm0, %v717_v1  ;;  %v527_v4 = vpack.c.bf16 %v88_v3, %v87_v2  ;;  %v173_v7 = vld [vmem:[#allocation7 + $0x10] sm:$0xff]  ;;  %v530_v8 = vpack.c.bf16 %v172_v6, %v171_v5  ;;  %v174_v9 = vld [vmem:[#allocation7 + $0x18] sm:$0xff]  ;;  %v86_v10 = vld [vmem:[#allocation2] sm:$0x3] }
  0x4c   :  { %v533_v11 = vpack.c.bf16 %v174_v9, %v173_v7  ;;  %v175_v12 = vld [vmem:[#allocation7 + $0x20] sm:$0xff]  ;;  %v176_v13 = vld [vmem:[#allocation7 + $0x28] sm:$0xff]  ;;  %v177_v15 = vld [vmem:[#allocation7 + $0x30] sm:$0xff] }
  0x4d   :  { %528 = vmatpush3.bf16.msra.mxu0 %v527_v4  ;;  %531 = vmatpush3.bf16.msra.mxu1 %v530_v8  ;;  %v536_v14 = vpack.c.bf16 %v176_v13, %v175_v12  ;;  %v178_v16 = vld [vmem:[#allocation7 + $0x38] sm:$0xff]  ;;  %v179_v18 = vld [vmem:[#allocation7 + $0x40] sm:$0xff]  ;;  %v180_v19 = vld [vmem:[#allocation7 + $0x48] sm:$0xff] }
  0x4e   :  { %553 = vmatprep.subr.bf16.mxu0 %v715_v0  ;;  %532 = vmatprep.subr.bf16.mxu1 %v715_v0  ;;  %v539_v17 = vpack.c.bf16 %v178_v16, %v177_v15  ;;  %v542_v20 = vpack.c.bf16 %v180_v19, %v179_v18  ;;  %v181_v21 = vld [vmem:[#allocation7 + $0x50] sm:$0xff]  ;;  %v182_v22 = vld [vmem:[#allocation7 + $0x58] sm:$0xff]  ;;  %v183_v24 = vld [vmem:[#allocation7 + $0x60] sm:$0xff] }
  0x4f   :  { %v545_v23 = vpack.c.bf16 %v182_v22, %v181_v21  ;;  %v184_v25 = vld [vmem:[#allocation7 + $0x68] sm:$0xff]  ;;  %v185_v27 = vld [vmem:[#allocation7 + $0x70] sm:$0xff]  ;;  %v186_v28 = vld [vmem:[#allocation7 + $0x78] sm:$0xff] }
  0x50   :  { %454 = vmatmul.mubr.msk.f32.vlgmr.msra.gmra.mrb[0].mxu0 %vm96_vm1, %v86_v10  ;;  %v548_v26 = vpack.c.bf16 %v184_v25, %v183_v24  ;;  %v551_v29 = vpack.c.bf16 %v186_v28, %v185_v27  ;;  %v265_v30 = vld [vmem:[#allocation8] sm:$0xff]  ;;  %v266_v31 = vld [vmem:[#allocation8 + $0x8] sm:$0xff]  ;;  %v267_v32 = vld [vmem:[#allocation8 + $0x10] sm:$0xff] }
  0x51   :  { %523 = vmatprep.mubr.msk.f32.mxu0 %vm716_vm0, %v717_v1  ;;  %534 = vmatpush3.bf16.msra.mxu1 %v533_v11  ;;  %v554_v33 = vpack.c.bf16 %v266_v31, %v265_v30  ;;  %v268_v34 = vld [vmem:[#allocation8 + $0x18] sm:$0xff]  ;;  %v269_v36 = vld [vmem:[#allocation8 + $0x20] sm:$0xff]  ;;  %v270_v37 = vld [vmem:[#allocation8 + $0x28] sm:$0xff] }
  0x52   :  { %535 = vmatprep.subr.bf16.mxu1 %v715_v0  ;;  %v557_v35 = vpack.c.bf16 %v268_v34, %v267_v32  ;;  %v560_v38 = vpack.c.bf16 %v270_v37, %v269_v36  ;;  %v271_v39 = vld [vmem:[#allocation8 + $0x30] sm:$0xff]  ;;  %v272_v40 = vld [vmem:[#allocation8 + $0x38] sm:$0xff]  ;;  %v273_v42 = vld [vmem:[#allocation8 + $0x40] sm:$0xff] }
  0x53   :  { %555 = vmatpush3.bf16.msra.mxu0 %v554_v33  ;;  %v563_v41 = vpack.c.bf16 %v272_v40, %v271_v39  ;;  %v274_v43 = vld [vmem:[#allocation8 + $0x48] sm:$0xff]  ;;  %v275_v45 = vld [vmem:[#allocation8 + $0x50] sm:$0xff]  ;;  %v276_v46 = vld [vmem:[#allocation8 + $0x58] sm:$0xff] }
  0x54   :  { %556 = vmatprep.subr.bf16.mxu0 %v715_v0  ;;  %v566_v44 = vpack.c.bf16 %v274_v43, %v273_v42  ;;  %v569_v47 = vpack.c.bf16 %v276_v46, %v275_v45  ;;  %v277_v48 = vld [vmem:[#allocation8 + $0x60] sm:$0xff]  ;;  %v278_v49 = vld [vmem:[#allocation8 + $0x68] sm:$0xff]  ;;  %v279_v56 = vld [vmem:[#allocation8 + $0x70] sm:$0xff] }
  0x55   :  { %537 = vmatpush3.bf16.msra.mxu1 %v536_v14  ;;  %v572_v50 = vpack.c.bf16 %v278_v49, %v277_v48  ;;  %v406_v51 = vld [vmem:[%s875_s2] ss:$0 sm:$0xff]  ;;  %v280_v57 = vld [vmem:[#allocation8 + $0x78] sm:$0xff] }
  0x56   :  { %538 = vmatprep.subr.bf16.mxu1 %v715_v0  ;;  %v575_v58 = vpack.c.bf16 %v280_v57, %v279_v56  ;;  %v408_v59 = vld [vmem:[%s877_s4] ss:$0 sm:$0xff] }
  0x57   :  { %558 = vmatpush3.bf16.msra.mxu0 %v557_v35  ;;  %v410_v2 = vld [vmem:[%s880_s7] ss:$0 sm:$0xff]  ;;  %s718_s7 = smov [#allocation10]  }
  0x58   :  { %559 = vmatprep.subr.bf16.mxu0 %v715_v0  ;;  %v411_v15 = vld [vmem:[%s881_s8] ss:$0 sm:$0xff]  ;;  %s395_s21 = sshll.u32 %s718_s7, 4  ;;  %s396_s21 = int_to_ptr.vmem [resolvable:$true] %s395_s21 }
  0x59   :  { %540 = vmatpush3.bf16.msra.mxu1 %v539_v17  ;;  %s679_s22 = scalar_lea.vmem %s396_s21, 32  ;;  %p684_p5 = scmp.lt.s32.totalorder %s396_s21, %s396_s21 }
  0x5a   :  { %541 = vmatprep.subr.bf16.mxu1 %v715_v0  ;;  %p680_p4 = scmp.ne.s32.totalorder %s396_s21, %s679_s22  ;;  %p685_p6 = scmp.lt.s32.totalorder %s679_s22, %s679_s22 }
  0x5b   :  { %561 = vmatpush3.bf16.msra.mxu0 %v560_v38 }
  0x5c   :  { %562 = vmatprep.subr.bf16.mxu0 %v715_v0  ;;  %p686_p7 = por %p685_p6, %p684_p5 }
  0x5d   :  { %543 = vmatpush3.bf16.msra.mxu1 %v542_v20 }
  0x5e   :  { %544 = vmatprep.subr.bf16.mxu1 %v715_v0  ;;  %p687_p8 = pnand %p686_p7, %p680_p4 }
  0x5f   :  { %564 = vmatpush3.bf16.msra.mxu0 %v563_v41 }
  0x60   :  { %565 = vmatprep.subr.bf16.mxu0 %v715_v0 }
  0x61   :  { %546 = vmatpush3.bf16.msra.mxu1 %v545_v23 }
  0x62   :  { %547 = vmatprep.subr.bf16.mxu1 %v715_v0 }
  0x63   :  { %567 = vmatpush3.bf16.msra.mxu0 %v566_v44 }
  0x64   :  { %568 = vmatprep.subr.bf16.mxu0 %v715_v0 }
  0x65   :  { %549 = vmatpush3.bf16.msra.mxu1 %v548_v26 }
  0x66   :  { %550 = vmatprep.subr.bf16.mxu1 %v715_v0 }
  0x67   :  { %570 = vmatpush3.bf16.msra.mxu0 %v569_v47 }
  0x68   :  { %571 = vmatprep.subr.bf16.mxu0 %v715_v0 }
  0x69   :  { %552 = vmatpush3.bf16.msra.mxu1 %v551_v29 }
  0x6b   :  { %573 = vmatpush3.bf16.msra.mxu0 %v572_v50 }
  0x6c   :  { %574 = vmatprep.subr.bf16.mxu0 %v715_v0  ;;  %v409_v0 = vld [vmem:[%s879_s6] ss:$0 sm:$0xff] }
  0x6f   :  { %576 = vmatpush3.bf16.msra.mxu0 %v575_v58 }
 0x123   :  { %v166_v52 = vpop.f32.mrb[0].mxu0 }
 0x124   :  { %v167_v53 = vadd.f32 %v406_v51, %v166_v52  ;;  %v455_v54 = vpop.f32.mrb[1].mxu0 }
 0x126   :  { %v170_v55 = vmax.f32 %v167_v53, 0.0 }
 0x128   :  { %489 = vmatmul.mubr.f32.vlgmr.msra.gmra.mrb[0].mxu1 %v170_v55 }
 0x1fb   :  { %v260_v60 = vpop.f32.mrb[0].mxu1 }
 0x1fc   :  { %v261_v61 = vadd.f32 %v408_v59, %v260_v60  ;;  %v490_v62 = vpop.f32.mrb[1].mxu1 }
 0x1fe   :  { %v264_v63 = vmax.f32 %v261_v61, 0.0 }
 0x200   :  { %524 = vmatmul.mubr.f32.vlgmr.msra.gmra.mrb[2].mxu0 %v264_v63 }
 0x2d3   :  { %v354_v1 = vpop.f32.mrb[2].mxu0 }
 0x2d4   :  { %v355_v3 = vadd.f32 %v409_v0, %v354_v1  ;;  %v525_v4 = vpop.f32.mrb[3].mxu0 }
 0x2d6   :  { %v365_v5 = vadd.f32 %v410_v2, %v355_v3 }
 0x2d8   :  { %v367_v6 = vsel %vm366_vm2, %v365_v5, -inf }
 0x2d9   :  { %368 = vmax.xlane.f32.xlu0 %v367_v6 }
 0x366   :  { %v369_v7 = vpop.xlane.xlu0 %368 }
 0x367   :  { %v370_v8 = vsub.f32 %v365_v5, %v369_v7 }
 0x369   :  { %v371_v9 = vmul.f32 1.442695, %v370_v8 }
 0x36b   :  { %587 = vpow2.f32 %v371_v9 }
 0x375   :  { %v588_v10 = vpop.eup %587 }
 0x376   :  { %v373_v11 = vsel %vm366_vm2, %v588_v10, 0.0 }
 0x377   :  { %374 = vadd.xlane.f32.xlu0 %v373_v11 }
 0x404   :  { %v375_v12 = vpop.xlane.xlu0 %374 }
 0x405   :  { %589 = vrcp.f32 %v375_v12 }
 0x40f   :  { %v590_v13 = vpop.eup %589 }
 0x410   :  { %v377_v14 = vmul.f32 %v590_v13, %v588_v10 }
 0x412   :  { %v379_v16 = vsub.f32 %v355_v3, %v377_v14 }
 0x414   :  { %v386_v17 = vmul.f32 %v411_v15, %v379_v16 }
 0x416   :  { %v387_v18 = vadd.f32 %v386_v17, %v377_v14 }
 0x418   :  { %388 = vst [vmem:[#allocation10] sm:$0x3] %v387_v18 }
 0x419   :  { %690 = shalt.err (!%p687_p8)
}
 0x41a   :  { %s691_s0 = scalar_lea.hbm %s882_s9, 32 }
 0x41b   :  { %p692_p9 = scmp.ne.s32.totalorder %s882_s9, %s691_s0  ;;  %p695_p10 = scmp.lt.u32.totalorder %s691_s0, %s882_s9 }
 0x41d   :  { %p697_p11 = pnand %p695_p10, %p692_p9 }
 0x41f   :  { %700 = shalt.err (!%p697_p11)
}
 0x420   :  { %398 = dma.vmem_to_hbm [thread:$0]  %s396_s21, 32, %s882_s9, [#allocation4]  }
 0x421   :  { %707 = dma.done.wait [#allocation4], 32  }
 0x422   :  { %708 = vsyncadd [#allocation4], 4294967264 }
 0x423   :  { %402 = vsyncpa [#allocation3], 1 }
 0x424   :  { %403 = vsyncpa [#allocation6], 1 }
 0x425   :  { %404 = vsyncpa [#allocation9], 1 }
 0x426   :  { %405 = vsyncpa [#allocation4], 1 }

</bundles_post_ra>
